<compile_context>
chip_gen: v7x
topology: tpu7x:2x2x1
jax: 0.10.0
libtpu: 0.0.40
codegen_flags: <defaults>
</compile_context>

<pallas_src>
import jax
import jax.numpy as jnp
from jax.experimental import pallas as pl
from jax.experimental.pallas import tpu as pltpu


def _round_up(x, m):
    return ((x + m - 1) // m) * m


def pack_params(params):
    """Pack (w1,b1,...,w4,b4) -- weights stored (in,out), biases (1,out) --
    into one transposed, 8-row-aligned weight buffer and one bias buffer.
    fc3/fc4 are fused into a single head block."""
    w1, b1, w2, b2, w3, b3, w4, b4 = params
    d_in, h1 = w1.shape
    h2 = w2.shape[1]
    d_out = w3.shape[1]

    h1p = _round_up(h1, 8)          # 40
    h2p = _round_up(h2, 8)          # 24
    dop = _round_up(d_out, 8)       # 8 (per head)
    max_cols = max(d_in, h1p, h2p)  # 40

    def wblk(wt, rows):             # wt: (rows_real, cols_real) transposed weight
        return jnp.pad(wt, ((0, rows - wt.shape[0]), (0, max_cols - wt.shape[1])))

    wpack = jnp.concatenate(
        [
            wblk(w1.T, h1p),        # rows [0, h1p)             : W1^T
            wblk(w2.T, h2p),        # rows [h1p, h1p+h2p)       : W2^T
            wblk(w3.T, dop),        # rows [.., ..+dop)         : W3^T (mu head)
            wblk(w4.T, dop),        # rows [.., ..+dop)         : W4^T (sigma head)
        ],
        axis=0,
    ).astype(jnp.float32)           # (h1p + h2p + 2*dop, max_cols)

    def bblk(b, rows):              # b: (1, n)
        return jnp.pad(b.T, ((0, rows - b.shape[1]), (0, 0)))

    bpack = jnp.concatenate(
        [bblk(b1, h1p), bblk(b2, h2p), bblk(b3, dop), bblk(b4, dop)], axis=0
    ).astype(jnp.float32)           # (h1p + h2p + 2*dop, 1)

    dims = dict(d_in=d_in, d_out=d_out, h1p=h1p, h2p=h2p, dop=dop)
    return wpack, bpack, dims


def _make_actor_kernel(dims):
    d_in, d_out = dims["d_in"], dims["d_out"]
    h1p, h2p, dop = dims["h1p"], dims["h2p"], dims["dop"]
    o2 = h1p                      # start of W2 block
    o3 = h1p + h2p                # start of fused mu/sigma head block

    def kernel(xT_ref, w_ref, b_ref, epsT_ref, outT_ref):
        x = xT_ref[...]                                           # (d_in, TB)

        # Static, sublane-aligned slices of the packed parameter buffers.
        w1t = w_ref[0:h1p, 0:d_in]                                # (h1p, d_in)
        w2t = w_ref[o2:o2 + h2p, 0:h1p]                           # (h2p, h1p)
        w34t = w_ref[o3:o3 + 2 * dop, 0:h2p]                      # (2*dop, h2p)
        b1 = b_ref[0:h1p, :]                                      # (h1p, 1) lane-broadcast
        b2 = b_ref[o2:o2 + h2p, :]
        b34 = b_ref[o3:o3 + 2 * dop, :]

        # Padded rows/cols are zero, so they contribute nothing downstream.
        a1 = jnp.tanh(jnp.dot(w1t, x, preferred_element_type=jnp.float32) + b1)   # (h1p, TB)
        a2 = jnp.tanh(jnp.dot(w2t, a1, preferred_element_type=jnp.float32) + b2)  # (h2p, TB)
        heads = jnp.dot(w34t, a2, preferred_element_type=jnp.float32) + b34       # (2*dop, TB)

        mu = jnp.tanh(heads[0:d_out, :])                          # (d_out, TB)
        sigma = jnp.logaddexp(heads[dop:dop + d_out, :], 0.0)     # stable softplus

        # Normal(mu, sigma).rsample() == mu + sigma * eps
        outT_ref[...] = mu + sigma * epsT_ref[...]

    return kernel


def actor_forward(x, packed, eps, *, tile_b=512):
    """x: (B, 6*A) f32, eps: (B, 3*A) f32 standard-normal noise. Returns (B, 3*A)."""
    wpack, bpack, dims = packed
    d_in, d_out = dims["d_in"], dims["d_out"]
    B = x.shape[0]

    # Lane axis must be a multiple of 128; 512-row batch tiles keep the
    # double-buffered x/eps/out blocks far below even v7x's VMEM limit.
    TB = min(tile_b, _round_up(max(B, 1), 128))
    B_pad = _round_up(B, TB)

    # Lane-dense layout: batch on the last (lane) axis, zero-padded columns.
    xT = jnp.pad(x.astype(jnp.float32).T, ((0, 0), (0, B_pad - B)))
    epsT = jnp.pad(eps.astype(jnp.float32).T, ((0, 0), (0, B_pad - B)))

    kernel = _make_actor_kernel(dims)

    outT = pl.pallas_call(
        kernel,
        out_shape=jax.ShapeDtypeStruct((d_out, B_pad), jnp.float32),
        grid_spec=pltpu.PrefetchScalarGridSpec(
            num_scalar_prefetch=0,
            grid=(B_pad // TB,),
            in_specs=[
                pl.BlockSpec((d_in, TB), lambda i: (0, i)),
                # Constant block index -> parameters stay resident in VMEM.
                pl.BlockSpec(wpack.shape, lambda i: (0, 0)),
                pl.BlockSpec(bpack.shape, lambda i: (0, 0)),
                pl.BlockSpec((d_out, TB), lambda i: (0, i)),
            ],
            out_specs=pl.BlockSpec((d_out, TB), lambda i: (0, i)),
        ),
        compiler_params=pltpu.CompilerParams(
            dimension_semantics=("parallel",),   # both TCs on v7x; no-op on v5e/v6e
            vmem_limit_bytes=32 * 1024 * 1024,
        ),
    )(xT, wpack, bpack, epsT)

    # Drop batch padding (padded lanes are never returned) -> (B, 3*A).
    return outT[:, :B].T


def init_linear(key, fan_in, fan_out):
    """Deterministic init mimicking torch.nn.Linear default (U[-1/sqrt(fan_in), +])."""
    kw, kb = jax.random.split(key)
    bound = 1.0 / jnp.sqrt(jnp.float32(fan_in))
    # Stored as (in, out) so the math matches PyTorch's x @ W.T with (out, in) weights.
    w = jax.random.uniform(kw, (fan_in, fan_out), jnp.float32, -bound, bound)
    b = jax.random.uniform(kb, (1, fan_out), jnp.float32, -bound, bound)
    return w, b


def _reference(x, params, eps):
    w1, b1, w2, b2, w3, b3, w4, b4 = params
    h1 = jnp.tanh(x @ w1 + b1)
    h2 = jnp.tanh(h1 @ w2 + b2)
    mu = jnp.tanh(h2 @ w3 + b3)
    sigma = jax.nn.softplus(h2 @ w4 + b4)
    return mu + sigma * eps


if __name__ == "__main__":
    agent_number = 2                 # env.agentNumber
    d_in = 6 * agent_number          # 12
    d_out = 3 * agent_number         # 6

    key = jax.random.PRNGKey(0)
    k_x, k_eps, k1, k2, k3, k4, k_x2, k_eps2 = jax.random.split(key, 8)

    w1, b1 = init_linear(k1, d_in, 40)
    w2, b2 = init_linear(k2, 40, 20)
    w3, b3 = init_linear(k3, 20, d_out)
    w4, b4 = init_linear(k4, 20, d_out)
    params = (w1, b1, w2, b2, w3, b3, w4, b4)
    packed = pack_params(params)

    # Small case matching the original module usage (batch = 4).
    # TODO(synk): eps is generated outside the kernel (reparameterized sampling);
    # in-kernel PRNG (pltpu.prng_*) would change the RNG stream vs. jax.random.
    batch = 4
    x = jax.random.normal(k_x, (batch, d_in), jnp.float32)
    eps = jax.random.normal(k_eps, (batch, d_out), jnp.float32)
    sample = actor_forward(x, packed, eps)
    jax.block_until_ready(sample)
    assert jnp.allclose(sample, _reference(x, params, eps), atol=1e-5), \
        "mismatch vs reference (small batch)"

    # Larger, non-aligned batch to exercise the batch grid / padding path.
    batch2 = 1000
    x2 = jax.random.normal(k_x2, (batch2, d_in), jnp.float32)
    eps2 = jax.random.normal(k_eps2, (batch2, d_out), jnp.float32)
    sample2 = actor_forward(x2, packed, eps2)
    jax.block_until_ready(sample2)
    assert jnp.allclose(sample2, _reference(x2, params, eps2), atol=1e-5), \
        "mismatch vs reference (batched / multi-step grid)"

    print("KERNEL_OK")
</pallas_src>

<mosaic_0001>
module attributes {stable_mosaic.version = 11 : i64} {
  func.func @kernel(%arg0: i32, %arg1: memref<12x128xf32, #tpu.memory_space<vmem>>, %arg2: memref<80x40xf32, #tpu.memory_space<vmem>>, %arg3: memref<80x1xf32, #tpu.memory_space<vmem>>, %arg4: memref<6x128xf32, #tpu.memory_space<vmem>>, %arg5: memref<6x128xf32, #tpu.memory_space<vmem>>) attributes {dimension_semantics = [#tpu.dimension_semantics<parallel>], iteration_bounds = array<i64: 1>, scalar_prefetch = 0 : i64, scratch_operands = 0 : i64, tpu.core_type = #tpu.core_type<tc>, window_params = [{transform_indices = @transform_0, window_bounds = array<i64: 12, 128>}, {pipeline_mode = #tpu.pipeline_mode<synchronous>, transform_indices = @transform_1, window_bounds = array<i64: 80, 40>}, {pipeline_mode = #tpu.pipeline_mode<synchronous>, transform_indices = @transform_2, window_bounds = array<i64: 80, 1>}, {transform_indices = @transform_3, window_bounds = array<i64: 6, 128>}, {transform_indices = @transform_4, window_bounds = array<i64: 6, 128>}]} {
    %c0 = arith.constant 0 : index
    %c0_0 = arith.constant 0 : index
    %0 = vector.load %arg1[%c0, %c0_0] : memref<12x128xf32, #tpu.memory_space<vmem>>, vector<12x128xf32>
    %c0_1 = arith.constant 0 : index
    %c0_2 = arith.constant 0 : index
    %1 = vector.load %arg2[%c0_1, %c0_2] : memref<80x40xf32, #tpu.memory_space<vmem>>, vector<40x12xf32>
    %c40 = arith.constant 40 : index
    %c0_3 = arith.constant 0 : index
    %2 = vector.load %arg2[%c40, %c0_3] : memref<80x40xf32, #tpu.memory_space<vmem>>, vector<24x40xf32>
    %c64 = arith.constant 64 : index
    %c0_4 = arith.constant 0 : index
    %3 = vector.load %arg2[%c64, %c0_4] : memref<80x40xf32, #tpu.memory_space<vmem>>, vector<16x24xf32>
    %c0_5 = arith.constant 0 : index
    %c0_6 = arith.constant 0 : index
    %4 = vector.load %arg3[%c0_5, %c0_6] : memref<80x1xf32, #tpu.memory_space<vmem>>, vector<40x1xf32>
    %c40_7 = arith.constant 40 : index
    %c0_8 = arith.constant 0 : index
    %5 = vector.load %arg3[%c40_7, %c0_8] : memref<80x1xf32, #tpu.memory_space<vmem>>, vector<24x1xf32>
    %c64_9 = arith.constant 64 : index
    %c0_10 = arith.constant 0 : index
    %6 = vector.load %arg3[%c64_9, %c0_10] : memref<80x1xf32, #tpu.memory_space<vmem>>, vector<16x1xf32>
    %cst = arith.constant dense<0.000000e+00> : vector<40x128xf32>
    %7 = tpu.matmul %1, %0, %cst {dimension_numbers = #tpu.dot_dimension_numbers<[1], [0], [0], [1], [0, 0, 1, 1], [], []>} : vector<40x12xf32>, vector<12x128xf32>, vector<40x128xf32> -> vector<40x128xf32>
    %8 = vector.broadcast %4 : vector<40x1xf32> to vector<40x128xf32>
    %9 = arith.addf %7, %8 : vector<40x128xf32>
    %10 = math.tanh %9 : vector<40x128xf32>
    %cst_11 = arith.constant dense<0.000000e+00> : vector<24x128xf32>
    %11 = tpu.matmul %2, %10, %cst_11 {dimension_numbers = #tpu.dot_dimension_numbers<[1], [0], [0], [1], [0, 0, 1, 1], [], []>} : vector<24x40xf32>, vector<40x128xf32>, vector<24x128xf32> -> vector<24x128xf32>
    %12 = vector.broadcast %5 : vector<24x1xf32> to vector<24x128xf32>
    %13 = arith.addf %11, %12 : vector<24x128xf32>
    %14 = math.tanh %13 : vector<24x128xf32>
    %cst_12 = arith.constant dense<0.000000e+00> : vector<16x128xf32>
    %15 = tpu.matmul %3, %14, %cst_12 {dimension_numbers = #tpu.dot_dimension_numbers<[1], [0], [0], [1], [0, 0, 1, 1], [], []>} : vector<16x24xf32>, vector<24x128xf32>, vector<16x128xf32> -> vector<16x128xf32>
    %16 = vector.broadcast %6 : vector<16x1xf32> to vector<16x128xf32>
    %17 = arith.addf %15, %16 : vector<16x128xf32>
    %18 = vector.extract_strided_slice %17 {offsets = [0, 0], sizes = [6, 128], strides = [1, 1]} : vector<16x128xf32> to vector<6x128xf32>
    %19 = math.tanh %18 : vector<6x128xf32>
    %20 = vector.extract_strided_slice %17 {offsets = [8, 0], sizes = [6, 128], strides = [1, 1]} : vector<16x128xf32> to vector<6x128xf32>
    %cst_13 = arith.constant 0.000000e+00 : f32
    %21 = vector.broadcast %cst_13 : f32 to vector<6x128xf32>
    %22 = arith.maximumf %20, %21 : vector<6x128xf32>
    %23 = vector.broadcast %cst_13 : f32 to vector<6x128xf32>
    %24 = arith.subf %20, %23 : vector<6x128xf32>
    %25 = arith.cmpf one, %24, %24 : vector<6x128xf32>
    %26 = vector.broadcast %cst_13 : f32 to vector<6x128xf32>
    %27 = arith.addf %20, %26 : vector<6x128xf32>
    %28 = math.absf %24 : vector<6x128xf32>
    %cst_14 = arith.constant 0.000000e+00 : f32
    %29 = vector.broadcast %cst_14 : f32 to vector<6x128xf32>
    %30 = arith.subf %29, %28 : vector<6x128xf32>
    %31 = math.exp %30 : vector<6x128xf32>
    %32 = math.log1p %31 : vector<6x128xf32>
    %33 = arith.addf %22, %32 : vector<6x128xf32>
    %34 = arith.select %25, %27, %33 : vector<6x128xi1>, vector<6x128xf32>
    %c0_15 = arith.constant 0 : index
    %c0_16 = arith.constant 0 : index
    %35 = vector.load %arg4[%c0_15, %c0_16] : memref<6x128xf32, #tpu.memory_space<vmem>>, vector<6x128xf32>
    %36 = arith.mulf %34, %35 : vector<6x128xf32>
    %37 = arith.addf %19, %36 : vector<6x128xf32>
    %c0_17 = arith.constant 0 : index
    %c0_18 = arith.constant 0 : index
    %38 = vector.load %arg5[%c0_17, %c0_18] : memref<6x128xf32, #tpu.memory_space<vmem>>, vector<6x128xf32>
    tpu.vector_store %arg5[%c0_17, %c0_18], %37 {strides = array<i32>} : memref<6x128xf32, #tpu.memory_space<vmem>>, vector<6x128xf32>,
    return
  }
  func.func @transform_0(%arg0: i32) -> (i32, i32) {
    %c0_i32 = arith.constant 0 : i32
    %c0_i32_0 = arith.constant 0 : i32
    return %c0_i32, %arg0 : i32, i32
  }
  func.func @transform_1(%arg0: i32) -> (i32, i32) {
    %c0_i32 = arith.constant 0 : i32
    %c0_i32_0 = arith.constant 0 : i32
    %c0_i32_1 = arith.constant 0 : i32
    return %c0_i32, %c0_i32_0 : i32, i32
  }
  func.func @transform_2(%arg0: i32) -> (i32, i32) {
    %c0_i32 = arith.constant 0 : i32
    %c0_i32_0 = arith.constant 0 : i32
    %c0_i32_1 = arith.constant 0 : i32
    return %c0_i32, %c0_i32_0 : i32, i32
  }
  func.func @transform_3(%arg0: i32) -> (i32, i32) {
    %c0_i32 = arith.constant 0 : i32
    %c0_i32_0 = arith.constant 0 : i32
    return %c0_i32, %arg0 : i32, i32
  }
  func.func @transform_4(%arg0: i32) -> (i32, i32) {
    %c0_i32 = arith.constant 0 : i32
    %c0_i32_0 = arith.constant 0 : i32
    return %c0_i32, %arg0 : i32, i32
  }
}

</mosaic_0001>

<bundles_post_ra>
// kernel: tpu_custom_call.1
= control target key start
LH: loop header
LB: loop body
LE: loop exit
PB: predicated region body
PF: predicated region fallthrough
CT: control target
= control target key end

     0   :  { %vm81_vm0 = vcmask 1043456   ;;  %v563_v2 = vmov 0.0|0.0   ;;  %vm564_vm1 = vmmov 1   ;;  %vm565_vm3 = vmmov 0   ;;  %s702_s0 = inlined_call_operand.vmem [shape: f32[12,128], index: 0, kind: input, shape index: {}]   ;;  %s703_s1 = inlined_call_operand.vmem [shape: f32[80,40], index: 1, kind: input, shape index: {}]   ;;  %s704_s2 = inlined_call_operand.vmem [shape: f32[80,1], index: 2, kind: input, shape index: {}]   ;;  %s705_s3 = inlined_call_operand.vmem [shape: f32[6,128], index: 3, kind: input, shape index: {}]   ;;  %s706_s4 = inlined_call_operand.hbm [shape: f32[6,128], index: 4, kind: output, shape index: {}]  }
   0x1   :  { %v18_v0 = vld [vmem:[%s702_s0] sm:$0xff]  ;;  %v19_v1 = vld [vmem:[%s702_s0 + $0x8] sm:$0xf]  ;;  %495 = vmatprep.subr.bf16.mxu0 %v563_v2  ;;  %vm497_vm2 = vmpackc.low %vm81_vm0, %vm564_vm1  ;;  %499 = vmatprep.subr.bf16.mxu1 %v563_v2  ;;  %v566_v4 = vmov 0.0   ;;  %vm65_vm4 = vcmask 97280   ;;  %v567_v6 = vmov 0  }
   0x2   :  { %v496_v3 = vpack.c.bf16 %v19_v1, %v18_v0  ;;  %452 = vmatprep.mubr.msk.f32.mxu0 %vm565_vm3, %v566_v4  ;;  %477 = vmatprep.mubr.msk.f32.mxu1 %vm565_vm3, %v566_v4  ;;  %v20_v5 = vld [vmem:[%s703_s1] sm:$0xff]  ;;  %v32_v8 = vld [vmem:[%s704_s2 + $0x10] sm:$0xff]  ;;  %v31_v9 = vld [vmem:[%s704_s2 + $0x8] sm:$0xff] }
   0x3   :  { %515 = vset.pattern.permute.xlu0 %v567_v6  ;;  %v30_v7 = vld [vmem:[%s704_s2] sm:$0xff]  ;;  %516 = vset.pattern.permute.xlu1 %v567_v6  ;;  %v33_v10 = vld [vmem:[%s704_s2 + $0x18] sm:$0xff] }
   0x4   :  { %498 = vmatpush3.bf16.msk.msra.mxu0 %vm497_vm2, %v496_v3  ;;  %42 = vperm.xlu0 %515, %v30_v7  }
   0x5   :  { %52 = vperm.xlu1 %516, %v32_v8  }
   0x7   :  { %453 = vmatmul.mubr.msk.f32.vlgmr.msra.gmra.mrb[0].mxu0 %vm65_vm4, %v20_v5 }
   0x8   :  { %9 = vsyncpa [#allocation3], 0  ;;  %455 = vmatprep.mubr.msk.f32.mxu0 %vm565_vm3, %v566_v4  ;;  %v21_v11 = vld [vmem:[%s703_s1 + $0x8] sm:$0xff]  ;;  %47 = vperm.xlu0 %515, %v31_v9   ;;  %v34_v12 = vld [vmem:[%s704_s2 + $0x20] sm:$0xff]  ;;  %vm195_vm5 = vcmask 326656   ;;  %vm298_vm6 = vcmask 195584  }
   0x9   :  { %57 = vperm.xlu1 %516, %v33_v10   ;;  %v35_v13 = vld [vmem:[%s704_s2 + $0x28] sm:$0xff]  ;;  %v22_v14 = vld [vmem:[%s703_s1 + $0x10] sm:$0xff]  ;;  %v37_v16 = vld [vmem:[%s704_s2 + $0x38] sm:$0xff]  ;;  %s568_s5 = smov [#allocation2]  }
   0xa   :  { %v36_v15 = vld [vmem:[%s704_s2 + $0x30] sm:$0xff]  ;;  %v23_v17 = vld [vmem:[%s703_s1 + $0x18] sm:$0xff]  ;;  %v39_v18 = vld [vmem:[%s704_s2 + $0x48] sm:$0xff]  ;;  %s409_s6 = sshll.u32 %s568_s5, 4  ;;  %s410_s6 = int_to_ptr.vmem [resolvable:$true] %s409_s6 }
   0xb   :  { %456 = vmatmul.mubr.msk.f32.gmra.mrb[2].mxu0 %vm65_vm4, %v21_v11  ;;  %v38_v19 = vld [vmem:[%s704_s2 + $0x40] sm:$0xff]  ;;  %v25_v47 = vld [vmem:[%s703_s1 + $0x28] sm:$0xff]  ;;  %v26_v49 = vld [vmem:[%s703_s1 + $0x30] sm:$0xff]  ;;  %s539_s7 = scalar_lea.vmem %s410_s6, 128  ;;  %p544_p1 = scmp.lt.s32.totalorder %s410_s6, %s410_s6 }
   0xc   :  { %458 = vmatprep.mubr.msk.f32.mxu0 %vm565_vm3, %v566_v4  ;;  %62 = vperm.xlu0 %515, %v34_v12   ;;  %v24_v20 = vld [vmem:[%s703_s1 + $0x20] sm:$0xff]  ;;  %v27_v50 = vld [vmem:[%s703_s1 + $0x38] sm:$0xff]  ;;  %p540_p0 = scmp.ne.s32.totalorder %s410_s6, %s539_s7  ;;  %p545_p2 = scmp.lt.s32.totalorder %s539_s7, %s539_s7 }
   0xd   :  { %182 = vperm.xlu1 %516, %v35_v13   ;;  %v28_v51 = vld [vmem:[%s703_s1 + $0x40] sm:$0xff] }
   0xe   :  { %p546_p3 = por %p545_p2, %p544_p1 }
   0xf   :  { %459 = vmatmul.mubr.msk.f32.gmra.mrb[4].mxu0 %vm65_vm4, %v22_v14 }
  0x10   :  { %461 = vmatprep.mubr.msk.f32.mxu0 %vm565_vm3, %v566_v4  ;;  %187 = vperm.xlu0 %515, %v36_v15   ;;  %p547_p4 = pnand %p546_p3, %p540_p0 }
  0x11   :  { %192 = vperm.xlu1 %516, %v37_v16  }
  0x13   :  { %462 = vmatmul.mubr.msk.f32.gmra.mrb[6].mxu0 %vm65_vm4, %v23_v17 }
  0x14   :  { %464 = vmatprep.mubr.msk.f32.mxu0 %vm565_vm3, %v566_v4  ;;  %295 = vperm.xlu0 %515, %v39_v18  }
  0x15   :  { %290 = vperm.xlu1 %516, %v38_v19  }
  0x17   :  { %465 = vmatmul.mubr.msk.f32.gmra.mrb[8].mxu0 %vm65_vm4, %v24_v20 }
  0x83   :  { %v43_v21 = vpop.permute.xlu0 %42 }
  0x84   :  { %v53_v29 = vpop.permute.xlu1 %52 }
  0x87   :  { %v48_v25 = vpop.permute.xlu0 %47 }
  0x88   :  { %v58_v33 = vpop.permute.xlu1 %57 }
  0x8b   :  { %v63_v38 = vpop.permute.xlu0 %62 }
  0x8c   :  { %v183_v53 = vpop.permute.xlu1 %182 }
  0x8f   :  { %v188_v56 = vpop.permute.xlu0 %187 }
  0x90   :  { %v193_v60 = vpop.permute.xlu1 %192 }
  0x93   :  { %v296_v5 = vpop.permute.xlu0 %295 }
  0x94   :  { %v291_v14 = vpop.permute.xlu1 %290 }
  0xda   :  { %v151_v22 = vpop.f32.mrb[0].mxu0 }
  0xdb   :  { %v454_v23 = vpop.f32.mrb[1].mxu0  ;;  %v152_v24 = vadd.f32 %v151_v22, %v43_v21 }
  0xdd   :  { %517 = vtanh.f32 %v152_v24 }
  0xde   :  { %v156_v26 = vpop.f32.mrb[2].mxu0 }
  0xdf   :  { %v157_v27 = vadd.f32 %v156_v26, %v48_v25  ;;  %v457_v28 = vpop.f32.mrb[3].mxu0  ;;  %v399_v25 = vld [vmem:[%s705_s3] sm:$0x3f] }
  0xe1   :  { %519 = vtanh.f32 %v157_v27 }
  0xe2   :  { %v161_v30 = vpop.f32.mrb[4].mxu0 }
  0xe3   :  { %v460_v31 = vpop.f32.mrb[5].mxu0  ;;  %v162_v32 = vadd.f32 %v161_v30, %v53_v29 }
  0xe5   :  { %521 = vtanh.f32 %v162_v32 }
  0xe6   :  { %v166_v34 = vpop.f32.mrb[6].mxu0 }
  0xe7   :  { %v167_v35 = vadd.f32 %v166_v34, %v58_v33  ;;  %v463_v36 = vpop.f32.mrb[7].mxu0  ;;  %v518_v37 = vpop.eup %517 }
  0xe9   :  { %523 = vtanh.f32 %v167_v35 }
  0xea   :  { %v171_v39 = vpop.f32.mrb[8].mxu0 }
  0xeb   :  { %v520_v40 = vpop.eup %519  ;;  %v172_v41 = vadd.f32 %v171_v39, %v63_v38  ;;  %v466_v42 = vpop.f32.mrb[9].mxu0 }
  0xec   :  { %v500_v43 = vpack.c.bf16 %v520_v40, %v518_v37 }
  0xed   :  { %525 = vtanh.f32 %v172_v41 }
  0xee   :  { %501 = vmatpush3.bf16.msra.mxu1 %v500_v43 }
  0xef   :  { %502 = vmatprep.subr.bf16.mxu1 %v563_v2  ;;  %v522_v44 = vpop.eup %521 }
  0xf3   :  { %v524_v45 = vpop.eup %523 }
  0xf4   :  { %v503_v46 = vpack.c.bf16 %v524_v45, %v522_v44 }
  0xf6   :  { %504 = vmatpush3.bf16.msra.mxu1 %v503_v46 }
  0xf7   :  { %475 = vmatprep.subr.mxu1 %v566_v4  ;;  %v526_v48 = vpop.eup %525 }
  0xfa   :  { %476 = vmatpush3.msra.mxu1 %v526_v48 }
  0xfb   :  { %478 = vmatmul.mubr.msk.f32.vlgmr.msra.gmra.mrb[0].mxu1 %vm195_vm5, %v25_v47 }
  0xfc   :  { %480 = vmatprep.mubr.msk.f32.mxu1 %vm565_vm3, %v566_v4 }
  0xff   :  { %481 = vmatmul.mubr.msk.f32.gmra.mrb[2].mxu1 %vm195_vm5, %v26_v49 }
 0x100   :  { %483 = vmatprep.mubr.msk.f32.mxu1 %vm565_vm3, %v566_v4  ;;  %v29_v4 = vld [vmem:[%s703_s1 + $0x48] sm:$0xff] }
 0x103   :  { %484 = vmatmul.mubr.msk.f32.gmra.mrb[4].mxu1 %vm195_vm5, %v27_v50 }
 0x104   :  { %492 = vmatprep.mubr.msk.f32.mxu1 %vm298_vm6, %v28_v51 }
 0x1ce   :  { %v271_v52 = vpop.f32.mrb[0].mxu1 }
 0x1cf   :  { %v479_v54 = vpop.f32.mrb[1].mxu1  ;;  %v272_v55 = vadd.f32 %v271_v52, %v183_v53 }
 0x1d1   :  { %527 = vtanh.f32 %v272_v55 }
 0x1d2   :  { %v276_v57 = vpop.f32.mrb[2].mxu1 }
 0x1d3   :  { %v277_v58 = vadd.f32 %v276_v57, %v188_v56  ;;  %v482_v59 = vpop.f32.mrb[3].mxu1 }
 0x1d5   :  { %529 = vtanh.f32 %v277_v58 }
 0x1d6   :  { %v281_v61 = vpop.f32.mrb[4].mxu1 }
 0x1d7   :  { %v282_v62 = vadd.f32 %v281_v61, %v193_v60  ;;  %v485_v63 = vpop.f32.mrb[5].mxu1 }
 0x1d9   :  { %531 = vtanh.f32 %v282_v62 }
 0x1db   :  { %v528_v0 = vpop.eup %527 }
 0x1df   :  { %v530_v1 = vpop.eup %529 }
 0x1e0   :  { %v505_v2 = vpack.c.bf16 %v530_v1, %v528_v0 }
 0x1e2   :  { %506 = vmatprep.subr.bf16.mxu1 %v505_v2 }
 0x1e3   :  { %v532_v3 = vpop.eup %531  ;;  %508 = vmatpush3.bf16.msra.mxu1 %v505_v2 }
 0x1e4   :  { %490 = vmatprep.subr.mxu1 %v532_v3 }
 0x1e7   :  { %491 = vmatpush3.msra.mxu1 %v532_v3 }
 0x1e8   :  { %493 = vmatmul.mubr.msk.f32.vlgmr.msra.gmra.mrb[6].mxu1 %vm298_vm6, %v29_v4 }
 0x2bb   :  { %v494_v6 = vpop.f32.mrb[6].mxu1 }
 0x2bc   :  { %v377_v7 = vadd.f32 %v494_v6, %v296_v5  ;;  %v371_v8 = vpop.f32.mrb[7].mxu1 }
 0x2bd   :  { %v372_v16 = vadd.f32 %v371_v8, %v291_v14 }
 0x2be   :  { %v384_v9 = vand.u32 2147483647, %v377_v7  ;;  %v381_v22 = vmax.f32 %v377_v7, 0.0  ;;  %vm382_vm8 = vcmp.ne.f32.partialorder %v377_v7, %v377_v7 }
 0x2c0   :  { %v385_v10 = vsub.f32 0.0, %v384_v9 }
 0x2c2   :  { %v386_v11 = vmul.f32 1.442695, %v385_v10 }
 0x2c4   :  { %533 = vpow2.f32 %v386_v11 }
 0x2ce   :  { %v534_v12 = vpop.eup %533 }
 0x2cf   :  { %v388_v13 = vadd.f32 1.0, %v534_v12  ;;  %v391_v15 = vmul.f32 -0.5, %v534_v12  ;;  %v394_v18 = vand.u32 2147483647, %v534_v12 }
 0x2d1   :  { %535 = vlog2.f32 %v388_v13  ;;  %v392_v17 = vadd.f32 1.0, %v391_v15  ;;  %vm395_vm7 = vcmp.lt.f32.partialorder %v394_v18, 0.0004427343 }
 0x2d2   :  { %537 = vtanh.f32 %v372_v16 }
 0x2d3   :  { %v393_v21 = vmul.f32 %v534_v12, %v392_v17 }
 0x2db   :  { %v536_v19 = vpop.eup %535 }
 0x2dc   :  { %v390_v20 = vmul.f32 0.6931472, %v536_v19  ;;  %v538_v28 = vpop.eup %537 }
 0x2de   :  { %v396_v23 = vsel %vm395_vm7, %v393_v21, %v390_v20 }
 0x2df   :  { %v397_v24 = vadd.f32 %v396_v23, %v381_v22 }
 0x2e1   :  { %v398_v26 = vsel %vm382_vm8, %v377_v7, %v397_v24 }
 0x2e2   :  { %v400_v27 = vmul.f32 %v399_v25, %v398_v26 }
 0x2e4   :  { %v401_v29 = vadd.f32 %v538_v28, %v400_v27 }
 0x2e6   :  { %402 = vst [vmem:[#allocation2] sm:$0x3f] %v401_v29 }
 0x2e7   :  { %550 = shalt.err (!%p547_p4)
}
 0x2e8   :  { %s551_s3 = scalar_lea.hbm %s706_s4, 128 }
 0x2e9   :  { %p552_p5 = scmp.ne.s32.totalorder %s706_s4, %s551_s3  ;;  %p555_p6 = scmp.lt.u32.totalorder %s551_s3, %s706_s4 }
 0x2eb   :  { %p557_p7 = pnand %p555_p6, %p552_p5 }
 0x2ed   :  { %560 = shalt.err (!%p557_p7)
}
 0x2ee   :  { %412 = dma.vmem_to_hbm [thread:$0]  %s410_s6, 128, %s706_s4, [#allocation3]  }
 0x2ef   :  { %561 = dma.done.wait [#allocation3], 128  }
 0x2f0   :  { %562 = vsyncadd [#allocation3], 4294967168 }
 0x2f1   :  { %416 = vsyncpa [#allocation3], 1 }

</bundles_post_ra>
